<compile_context>
chip_gen: v7x
topology: tpu7x:2x2x1
jax: 0.10.0
libtpu: 0.0.40
codegen_flags: <defaults>
</compile_context>

<pallas_src>
import jax
import jax.numpy as jnp
from jax.experimental import pallas as pl
from jax.experimental.pallas import tpu as pltpu


_UNROLL_T_MAX = 32


def _make_lstm_kernel(T, Bp, D_pad, H, unrolled):
    """Build the kernel for static (T, B_pad, D_pad, H).

    Operand layout (all resident in VMEM, tiny problem):
      x_ref:    (T*Bp, D_pad) bf16   time-major, batch- and feature-padded
      w_ref:    (D_pad+H, 4H) bf16   rows [0:D_pad)=W_ih^T, rows [D_pad:D_pad+H)=W_hh^T
                                     (g-gate quarter pre-scaled by 2)
      misc_ref: (Bp+3, 4H)    f32    rows [0:Bp) lane0 = last valid step index
                                     row Bp   = fused bias (g-quarter pre-scaled by 2)
                                     row Bp+1 = w_out (lanes [0:H))
                                     row Bp+2 lane0 = b_out
      out_ref:  (Bp, 1)       f32
    """
    G = 4 * H

    def compute_step(gx_t, h, c, w_hh_t):
        # Recurrent matmul on the serial h -> h chain (bf16 MXU operands, f32 acc).
        gates = gx_t + jnp.dot(h.astype(jnp.bfloat16), w_hh_t,
                               preferred_element_type=jnp.float32)      # (Bp, 4H)
        # ONE full-lane-width sigmoid push per step; tanh(g) comes out of the same
        # push because the g-quarter pre-activation was pre-scaled by 2:
        #   tanh(z) = 2*sigmoid(2z) - 1
        sig = jax.nn.sigmoid(gates)
        i_g = sig[:, 0 * H:1 * H]
        f_g = sig[:, 1 * H:2 * H]
        g_g = 2.0 * sig[:, 2 * H:3 * H] - 1.0
        o_g = sig[:, 3 * H:4 * H]
        c = f_g * c + i_g * g_g
        h = o_g * jnp.tanh(c)                       # only remaining per-step EUP op
        return h, c

    def finalize(last_h, misc, out_ref):
        # N=1 output head: VPU multiply + lane reduce (no 1-column MXU matmul).
        w_out = misc[Bp + 1:Bp + 2, 0:H]            # (1, H)
        b_out = misc[Bp + 2:Bp + 3, 0:1]            # (1, 1)
        logits = jnp.sum(last_h * w_out, axis=-1, keepdims=True) + b_out
        out_ref[...] = jax.nn.sigmoid(logits)

    if unrolled:
        def kernel(x_ref, w_ref, misc_ref, out_ref):
            w_ih_t = w_ref[0:D_pad, :]              # (D_pad, 4H) bf16
            w_hh_t = w_ref[D_pad:D_pad + H, :]      # (H, 4H)     bf16
            misc = misc_ref[...]                    # (Bp+3, 4H)  f32
            last_idx = misc[0:Bp, 0:1]              # (Bp, 1) f32 (small exact ints)
            b = misc[Bp:Bp + 1, :]                  # (1, 4H)

            # Whole-sequence input projection: one (T*Bp, D_pad)x(D_pad, 4H) matmul.
            gates_x = jnp.dot(x_ref[...], w_ih_t,
                              preferred_element_type=jnp.float32) + b   # (T*Bp, 4H)

            h = jnp.zeros((Bp, H), jnp.float32)
            c = jnp.zeros((Bp, H), jnp.float32)
            last_h = jnp.zeros((Bp, H), jnp.float32)
            # T is static and small: fully unrolled, register-resident gates slabs.
            for t in range(T):
                h, c = compute_step(gates_x[t * Bp:(t + 1) * Bp, :], h, c, w_hh_t)
                last_h = jnp.where(last_idx == jnp.float32(t), h, last_h)
            finalize(last_h, misc, out_ref)
        return kernel

    # Large-T path: bound live ranges with fori_loop(unroll=8) over a VMEM scratch.
    def kernel(x_ref, w_ref, misc_ref, out_ref, gx_ref):
        w_ih_t = w_ref[0:D_pad, :]
        w_hh_t = w_ref[D_pad:D_pad + H, :]
        misc = misc_ref[...]
        last_idx = misc[0:Bp, 0:1]
        b = misc[Bp:Bp + 1, :]

        gx_ref[...] = jnp.dot(x_ref[...], w_ih_t,
                              preferred_element_type=jnp.float32) + b

        def body(t, carry):
            h, c, last_h = carry
            row = pl.multiple_of(t * Bp, Bp)
            gx_t = gx_ref[pl.ds(row, Bp), :]
            h, c = compute_step(gx_t, h, c, w_hh_t)
            last_h = jnp.where(last_idx == t.astype(jnp.float32), h, last_h)
            return h, c, last_h

        zeros = lambda: jnp.zeros((Bp, H), jnp.float32)
        h, c, last_h = jax.lax.fori_loop(0, T, body, (zeros(), zeros(), zeros()),
                                         unroll=8)
        finalize(last_h, misc, out_ref)
    return kernel


def prepare_params(params):
    """One-time weight preprocessing (hoisted out of the per-call hot path)."""
    w_ih = params['w_ih']                 # (4H, D)
    w_hh = params['w_hh']                 # (4H, H)
    G, D = w_ih.shape
    H = w_hh.shape[1]
    # Pad the input-feature axis to a bf16 sublane-tile multiple so both weight
    # blocks in the packed buffer start on aligned rows.
    D_pad = max(16, ((D + 15) // 16) * 16)

    # tanh(z) = 2*sigmoid(2z) - 1  ->  pre-double the g-gate quarter of every
    # pre-activation contribution (exact in bf16/f32: power-of-two scale).
    gate_scale = jnp.ones((G,), jnp.float32).at[2 * H:3 * H].set(2.0)

    w_ih_t = jnp.zeros((D_pad, G), jnp.float32).at[:D, :].set((w_ih * gate_scale[:, None]).T)
    w_hh_t = (w_hh * gate_scale[:, None]).T                                  # (H, 4H)
    # Single packed bf16 MXU-operand buffer.
    w_packed = jnp.concatenate([w_ih_t, w_hh_t], axis=0).astype(jnp.bfloat16)

    # Static part of the packed f32 misc buffer (bias row, output head rows).
    b_row = ((params['b_ih'] + params['b_hh']) * gate_scale).reshape(1, G)
    w_out_row = jnp.zeros((1, G), jnp.float32).at[0, :H].set(params['w_out'].reshape(-1))
    b_out_row = jnp.zeros((1, G), jnp.float32).at[0, 0].set(params['b_out'][0])
    misc_static = jnp.concatenate([b_row, w_out_row, b_out_row], axis=0)     # (3, 4H)

    return {'w_packed': w_packed, 'misc_static': misc_static}


def _lstm_forward_impl(x, mask, w_packed, misc_static):
    """x: (B, T, D) f32, mask: (B, T) f32 in {0,1} (left-contiguous)."""
    B, T, D = x.shape
    G = w_packed.shape[1]
    H = G // 4
    D_pad = w_packed.shape[0] - H
    Bp = max(8, ((B + 7) // 8) * 8)

    # Last valid index per sequence, computed in the wrapper (no XLU reduce in the
    # kernel).  Zero-length sequences map to T-1, matching the reference's
    # negative-index (-1) gather semantics.  Stored as f32 (small exact integers).
    lengths = mask.sum(axis=1)
    last_idx = jnp.where(lengths > 0, lengths - 1, T - 1).astype(jnp.float32)   # (B,)
    last_rows = jnp.zeros((Bp, G), jnp.float32).at[:B, 0].set(last_idx)
    misc = jnp.concatenate([last_rows, misc_static], axis=0)                   # (Bp+3, 4H)

    # Time-major, batch/feature-padded, flattened to 2-D, bf16 MXU operand.
    x_tb = jnp.transpose(x, (1, 0, 2))                                         # (T, B, D)
    x_tb = jnp.pad(x_tb, ((0, 0), (0, Bp - B), (0, D_pad - D)))
    x2d = x_tb.reshape(T * Bp, D_pad).astype(jnp.bfloat16)

    unrolled = T <= _UNROLL_T_MAX
    kernel = _make_lstm_kernel(T, Bp, D_pad, H, unrolled)
    vmem = pl.BlockSpec(memory_space=pltpu.MemorySpace.VMEM)
    scratch = [] if unrolled else [pltpu.VMEM((T * Bp, G), jnp.float32)]

    out = pl.pallas_call(
        kernel,
        out_shape=jax.ShapeDtypeStruct((Bp, 1), jnp.float32),
        in_specs=[vmem, vmem, vmem],
        out_specs=vmem,
        scratch_shapes=scratch,
    )(x2d, w_packed, misc)
    return out[:B]


# jit the per-call wrapper so the transpose/pad/mask glue fuses into one dispatch.
lstm_forward = jax.jit(_lstm_forward_impl)


def lstm_reference(x, mask, params):
    """Pure-JAX f32 reference mirroring the PyTorch forward."""
    B, T, D = x.shape
    H = params['w_hh'].shape[1]
    w_ih, w_hh = params['w_ih'], params['w_hh']
    b = params['b_ih'] + params['b_hh']
    h = jnp.zeros((B, H), jnp.float32)
    c = jnp.zeros((B, H), jnp.float32)
    hs = []
    for t in range(T):
        gates = x[:, t, :] @ w_ih.T + h @ w_hh.T + b
        i_g = jax.nn.sigmoid(gates[:, 0 * H:1 * H])
        f_g = jax.nn.sigmoid(gates[:, 1 * H:2 * H])
        g_g = jnp.tanh(gates[:, 2 * H:3 * H])
        o_g = jax.nn.sigmoid(gates[:, 3 * H:4 * H])
        c = f_g * c + i_g * g_g
        h = o_g * jnp.tanh(c)
        hs.append(h)
    hs = jnp.stack(hs, axis=1)                                        # (B, T, H)
    last_idx = mask.sum(axis=1).astype(jnp.int32) - 1
    last_h = hs[jnp.arange(B), last_idx]                              # (B, H)
    return jax.nn.sigmoid(last_h @ params['w_out'].T + params['b_out'])


if __name__ == "__main__":
    B, T, D, H = 2, 8, 4, 32   # batch, seq, input_dim, hidden_dim

    key = jax.random.PRNGKey(0)
    keys = jax.random.split(key, 8)
    scale = 1.0 / jnp.sqrt(H)
    params = {
        'w_ih': jax.random.uniform(keys[0], (4 * H, D), jnp.float32, -scale, scale),
        'w_hh': jax.random.uniform(keys[1], (4 * H, H), jnp.float32, -scale, scale),
        'b_ih': jax.random.uniform(keys[2], (4 * H,), jnp.float32, -scale, scale),
        'b_hh': jax.random.uniform(keys[3], (4 * H,), jnp.float32, -scale, scale),
        'w_out': jax.random.uniform(keys[4], (1, H), jnp.float32, -scale, scale),
        'b_out': jax.random.uniform(keys[5], (1,), jnp.float32, -scale, scale),
    }

    x = jax.random.normal(keys[6], (B, T, D), jnp.float32)
    # Left-contiguous validity mask (lengths 5 and 8).
    lengths = jnp.array([5, 8], jnp.int32)
    mask = (jnp.arange(T)[None, :] < lengths[:, None]).astype(jnp.float32)

    prepared = prepare_params(params)    # one-time weight packing / pre-scaling
    out = lstm_forward(x, mask, prepared['w_packed'], prepared['misc_static'])
    out = jax.block_until_ready(out)

    ref = lstm_reference(x, mask, params)
    assert out.shape == (B, 1)
    # bf16 MXU operands (per the perf review) shift the numerics slightly vs. the
    # f32 reference; 2e-2 absolute tolerance on a sigmoid output in [0,1] is ample.
    assert jnp.allclose(out, ref, atol=2e-2, rtol=0.0), (out, ref)

    print("KERNEL_OK")
</pallas_src>

<mosaic_0001>
module attributes {stable_mosaic.version = 11 : i64} {
  func.func @kernel(%arg0: memref<64x16xbf16, #tpu.memory_space<vmem>>, %arg1: memref<48x128xbf16, #tpu.memory_space<vmem>>, %arg2: memref<11x128xf32, #tpu.memory_space<vmem>>, %arg3: memref<8x1xf32, #tpu.memory_space<vmem>>) attributes {dimension_semantics = [], scalar_prefetch = 0 : i64, scratch_operands = 0 : i64, tpu.core_type = #tpu.core_type<tc>} {
    %c0 = arith.constant 0 : index
    %c0_0 = arith.constant 0 : index
    %0 = vector.load %arg1[%c0, %c0_0] : memref<48x128xbf16, #tpu.memory_space<vmem>>, vector<16x128xbf16>
    %c16 = arith.constant 16 : index
    %c0_1 = arith.constant 0 : index
    %1 = vector.load %arg1[%c16, %c0_1] : memref<48x128xbf16, #tpu.memory_space<vmem>>, vector<32x128xbf16>
    %c0_2 = arith.constant 0 : index
    %c0_3 = arith.constant 0 : index
    %2 = vector.load %arg2[%c0_2, %c0_3] : memref<11x128xf32, #tpu.memory_space<vmem>>, vector<11x128xf32>
    %3 = vector.extract_strided_slice %2 {offsets = [0, 0], sizes = [8, 1], strides = [1, 1]} : vector<11x128xf32> to vector<8x1xf32>
    %4 = vector.extract_strided_slice %2 {offsets = [8, 0], sizes = [1, 128], strides = [1, 1]} : vector<11x128xf32> to vector<1x128xf32>
    %c0_4 = arith.constant 0 : index
    %c0_5 = arith.constant 0 : index
    %5 = vector.load %arg0[%c0_4, %c0_5] : memref<64x16xbf16, #tpu.memory_space<vmem>>, vector<64x16xbf16>
    %cst = arith.constant dense<0.000000e+00> : vector<64x128xf32>
    %6 = tpu.matmul %5, %0, %cst {dimension_numbers = #tpu.dot_dimension_numbers<[1], [0], [0], [1], [0, 0, 1, 1], [], []>} : vector<64x16xbf16>, vector<16x128xbf16>, vector<64x128xf32> -> vector<64x128xf32>
    %7 = vector.broadcast %4 : vector<1x128xf32> to vector<64x128xf32>
    %8 = arith.addf %6, %7 : vector<64x128xf32>
    %cst_6 = arith.constant 0.000000e+00 : f32
    %9 = vector.broadcast %cst_6 : f32 to vector<8x32xf32>
    %cst_7 = arith.constant 0.000000e+00 : f32
    %10 = vector.broadcast %cst_7 : f32 to vector<8x32xf32>
    %cst_8 = arith.constant 0.000000e+00 : f32
    %11 = vector.broadcast %cst_8 : f32 to vector<8x32xf32>
    %12 = vector.extract_strided_slice %8 {offsets = [0, 0], sizes = [8, 128], strides = [1, 1]} : vector<64x128xf32> to vector<8x128xf32>
    %13 = arith.truncf %9 : vector<8x32xf32> to vector<8x32xbf16>
    %cst_9 = arith.constant dense<0.000000e+00> : vector<8x128xf32>
    %14 = tpu.matmul %13, %1, %cst_9 {dimension_numbers = #tpu.dot_dimension_numbers<[1], [0], [0], [1], [0, 0, 1, 1], [], []>} : vector<8x32xbf16>, vector<32x128xbf16>, vector<8x128xf32> -> vector<8x128xf32>
    %15 = arith.addf %12, %14 : vector<8x128xf32>
    %16 = arith.negf %15 : vector<8x128xf32>
    %17 = math.exp %16 : vector<8x128xf32>
    %cst_10 = arith.constant 1.000000e+00 : f32
    %18 = vector.broadcast %cst_10 : f32 to vector<8x128xf32>
    %19 = arith.addf %18, %17 : vector<8x128xf32>
    %20 = arith.divf %18, %19 : vector<8x128xf32>
    %21 = vector.extract_strided_slice %20 {offsets = [0, 0], sizes = [8, 32], strides = [1, 1]} : vector<8x128xf32> to vector<8x32xf32>
    %22 = vector.extract_strided_slice %20 {offsets = [0, 32], sizes = [8, 32], strides = [1, 1]} : vector<8x128xf32> to vector<8x32xf32>
    %23 = vector.extract_strided_slice %20 {offsets = [0, 64], sizes = [8, 32], strides = [1, 1]} : vector<8x128xf32> to vector<8x32xf32>
    %cst_11 = arith.constant 2.000000e+00 : f32
    %24 = vector.broadcast %cst_11 : f32 to vector<8x32xf32>
    %25 = arith.mulf %24, %23 : vector<8x32xf32>
    %cst_12 = arith.constant 1.000000e+00 : f32
    %26 = vector.broadcast %cst_12 : f32 to vector<8x32xf32>
    %27 = arith.subf %25, %26 : vector<8x32xf32>
    %28 = vector.extract_strided_slice %20 {offsets = [0, 96], sizes = [8, 32], strides = [1, 1]} : vector<8x128xf32> to vector<8x32xf32>
    %29 = arith.mulf %22, %10 : vector<8x32xf32>
    %30 = arith.mulf %21, %27 : vector<8x32xf32>
    %31 = arith.addf %29, %30 : vector<8x32xf32>
    %32 = math.tanh %31 : vector<8x32xf32>
    %33 = arith.mulf %28, %32 : vector<8x32xf32>
    %cst_13 = arith.constant 0.000000e+00 : f32
    %34 = vector.broadcast %cst_13 : f32 to vector<8x1xf32>
    %35 = arith.cmpf oeq, %3, %34 : vector<8x1xf32>
    %36 = vector.shape_cast %35 : vector<8x1xi1> to vector<8x1xi1>
    %37 = vector.broadcast %36 : vector<8x1xi1> to vector<8x32xi1>
    %38 = arith.select %37, %33, %11 : vector<8x32xi1>, vector<8x32xf32>
    %39 = vector.extract_strided_slice %8 {offsets = [8, 0], sizes = [8, 128], strides = [1, 1]} : vector<64x128xf32> to vector<8x128xf32>
    %40 = arith.truncf %33 : vector<8x32xf32> to vector<8x32xbf16>
    %cst_14 = arith.constant dense<0.000000e+00> : vector<8x128xf32>
    %41 = tpu.matmul %40, %1, %cst_14 {dimension_numbers = #tpu.dot_dimension_numbers<[1], [0], [0], [1], [0, 0, 1, 1], [], []>} : vector<8x32xbf16>, vector<32x128xbf16>, vector<8x128xf32> -> vector<8x128xf32>
    %42 = arith.addf %39, %41 : vector<8x128xf32>
    %43 = arith.negf %42 : vector<8x128xf32>
    %44 = math.exp %43 : vector<8x128xf32>
    %cst_15 = arith.constant 1.000000e+00 : f32
    %45 = vector.broadcast %cst_15 : f32 to vector<8x128xf32>
    %46 = arith.addf %45, %44 : vector<8x128xf32>
    %47 = arith.divf %45, %46 : vector<8x128xf32>
    %48 = vector.extract_strided_slice %47 {offsets = [0, 0], sizes = [8, 32], strides = [1, 1]} : vector<8x128xf32> to vector<8x32xf32>
    %49 = vector.extract_strided_slice %47 {offsets = [0, 32], sizes = [8, 32], strides = [1, 1]} : vector<8x128xf32> to vector<8x32xf32>
    %50 = vector.extract_strided_slice %47 {offsets = [0, 64], sizes = [8, 32], strides = [1, 1]} : vector<8x128xf32> to vector<8x32xf32>
    %cst_16 = arith.constant 2.000000e+00 : f32
    %51 = vector.broadcast %cst_16 : f32 to vector<8x32xf32>
    %52 = arith.mulf %51, %50 : vector<8x32xf32>
    %cst_17 = arith.constant 1.000000e+00 : f32
    %53 = vector.broadcast %cst_17 : f32 to vector<8x32xf32>
    %54 = arith.subf %52, %53 : vector<8x32xf32>
    %55 = vector.extract_strided_slice %47 {offsets = [0, 96], sizes = [8, 32], strides = [1, 1]} : vector<8x128xf32> to vector<8x32xf32>
    %56 = arith.mulf %49, %31 : vector<8x32xf32>
    %57 = arith.mulf %48, %54 : vector<8x32xf32>
    %58 = arith.addf %56, %57 : vector<8x32xf32>
    %59 = math.tanh %58 : vector<8x32xf32>
    %60 = arith.mulf %55, %59 : vector<8x32xf32>
    %cst_18 = arith.constant 1.000000e+00 : f32
    %61 = vector.broadcast %cst_18 : f32 to vector<8x1xf32>
    %62 = arith.cmpf oeq, %3, %61 : vector<8x1xf32>
    %63 = vector.shape_cast %62 : vector<8x1xi1> to vector<8x1xi1>
    %64 = vector.broadcast %63 : vector<8x1xi1> to vector<8x32xi1>
    %65 = arith.select %64, %60, %38 : vector<8x32xi1>, vector<8x32xf32>
    %66 = vector.extract_strided_slice %8 {offsets = [16, 0], sizes = [8, 128], strides = [1, 1]} : vector<64x128xf32> to vector<8x128xf32>
    %67 = arith.truncf %60 : vector<8x32xf32> to vector<8x32xbf16>
    %cst_19 = arith.constant dense<0.000000e+00> : vector<8x128xf32>
    %68 = tpu.matmul %67, %1, %cst_19 {dimension_numbers = #tpu.dot_dimension_numbers<[1], [0], [0], [1], [0, 0, 1, 1], [], []>} : vector<8x32xbf16>, vector<32x128xbf16>, vector<8x128xf32> -> vector<8x128xf32>
    %69 = arith.addf %66, %68 : vector<8x128xf32>
    %70 = arith.negf %69 : vector<8x128xf32>
    %71 = math.exp %70 : vector<8x128xf32>
    %cst_20 = arith.constant 1.000000e+00 : f32
    %72 = vector.broadcast %cst_20 : f32 to vector<8x128xf32>
    %73 = arith.addf %72, %71 : vector<8x128xf32>
    %74 = arith.divf %72, %73 : vector<8x128xf32>
    %75 = vector.extract_strided_slice %74 {offsets = [0, 0], sizes = [8, 32], strides = [1, 1]} : vector<8x128xf32> to vector<8x32xf32>
    %76 = vector.extract_strided_slice %74 {offsets = [0, 32], sizes = [8, 32], strides = [1, 1]} : vector<8x128xf32> to vector<8x32xf32>
    %77 = vector.extract_strided_slice %74 {offsets = [0, 64], sizes = [8, 32], strides = [1, 1]} : vector<8x128xf32> to vector<8x32xf32>
    %cst_21 = arith.constant 2.000000e+00 : f32
    %78 = vector.broadcast %cst_21 : f32 to vector<8x32xf32>
    %79 = arith.mulf %78, %77 : vector<8x32xf32>
    %cst_22 = arith.constant 1.000000e+00 : f32
    %80 = vector.broadcast %cst_22 : f32 to vector<8x32xf32>
    %81 = arith.subf %79, %80 : vector<8x32xf32>
    %82 = vector.extract_strided_slice %74 {offsets = [0, 96], sizes = [8, 32], strides = [1, 1]} : vector<8x128xf32> to vector<8x32xf32>
    %83 = arith.mulf %76, %58 : vector<8x32xf32>
    %84 = arith.mulf %75, %81 : vector<8x32xf32>
    %85 = arith.addf %83, %84 : vector<8x32xf32>
    %86 = math.tanh %85 : vector<8x32xf32>
    %87 = arith.mulf %82, %86 : vector<8x32xf32>
    %cst_23 = arith.constant 2.000000e+00 : f32
    %88 = vector.broadcast %cst_23 : f32 to vector<8x1xf32>
    %89 = arith.cmpf oeq, %3, %88 : vector<8x1xf32>
    %90 = vector.shape_cast %89 : vector<8x1xi1> to vector<8x1xi1>
    %91 = vector.broadcast %90 : vector<8x1xi1> to vector<8x32xi1>
    %92 = arith.select %91, %87, %65 : vector<8x32xi1>, vector<8x32xf32>
    %93 = vector.extract_strided_slice %8 {offsets = [24, 0], sizes = [8, 128], strides = [1, 1]} : vector<64x128xf32> to vector<8x128xf32>
    %94 = arith.truncf %87 : vector<8x32xf32> to vector<8x32xbf16>
    %cst_24 = arith.constant dense<0.000000e+00> : vector<8x128xf32>
    %95 = tpu.matmul %94, %1, %cst_24 {dimension_numbers = #tpu.dot_dimension_numbers<[1], [0], [0], [1], [0, 0, 1, 1], [], []>} : vector<8x32xbf16>, vector<32x128xbf16>, vector<8x128xf32> -> vector<8x128xf32>
    %96 = arith.addf %93, %95 : vector<8x128xf32>
    %97 = arith.negf %96 : vector<8x128xf32>
    %98 = math.exp %97 : vector<8x128xf32>
    %cst_25 = arith.constant 1.000000e+00 : f32
    %99 = vector.broadcast %cst_25 : f32 to vector<8x128xf32>
    %100 = arith.addf %99, %98 : vector<8x128xf32>
    %101 = arith.divf %99, %100 : vector<8x128xf32>
    %102 = vector.extract_strided_slice %101 {offsets = [0, 0], sizes = [8, 32], strides = [1, 1]} : vector<8x128xf32> to vector<8x32xf32>
    %103 = vector.extract_strided_slice %101 {offsets = [0, 32], sizes = [8, 32], strides = [1, 1]} : vector<8x128xf32> to vector<8x32xf32>
    %104 = vector.extract_strided_slice %101 {offsets = [0, 64], sizes = [8, 32], strides = [1, 1]} : vector<8x128xf32> to vector<8x32xf32>
    %cst_26 = arith.constant 2.000000e+00 : f32
    %105 = vector.broadcast %cst_26 : f32 to vector<8x32xf32>
    %106 = arith.mulf %105, %104 : vector<8x32xf32>
    %cst_27 = arith.constant 1.000000e+00 : f32
    %107 = vector.broadcast %cst_27 : f32 to vector<8x32xf32>
    %108 = arith.subf %106, %107 : vector<8x32xf32>
    %109 = vector.extract_strided_slice %101 {offsets = [0, 96], sizes = [8, 32], strides = [1, 1]} : vector<8x128xf32> to vector<8x32xf32>
    %110 = arith.mulf %103, %85 : vector<8x32xf32>
    %111 = arith.mulf %102, %108 : vector<8x32xf32>
    %112 = arith.addf %110, %111 : vector<8x32xf32>
    %113 = math.tanh %112 : vector<8x32xf32>
    %114 = arith.mulf %109, %113 : vector<8x32xf32>
    %cst_28 = arith.constant 3.000000e+00 : f32
    %115 = vector.broadcast %cst_28 : f32 to vector<8x1xf32>
    %116 = arith.cmpf oeq, %3, %115 : vector<8x1xf32>
    %117 = vector.shape_cast %116 : vector<8x1xi1> to vector<8x1xi1>
    %118 = vector.broadcast %117 : vector<8x1xi1> to vector<8x32xi1>
    %119 = arith.select %118, %114, %92 : vector<8x32xi1>, vector<8x32xf32>
    %120 = vector.extract_strided_slice %8 {offsets = [32, 0], sizes = [8, 128], strides = [1, 1]} : vector<64x128xf32> to vector<8x128xf32>
    %121 = arith.truncf %114 : vector<8x32xf32> to vector<8x32xbf16>
    %cst_29 = arith.constant dense<0.000000e+00> : vector<8x128xf32>
    %122 = tpu.matmul %121, %1, %cst_29 {dimension_numbers = #tpu.dot_dimension_numbers<[1], [0], [0], [1], [0, 0, 1, 1], [], []>} : vector<8x32xbf16>, vector<32x128xbf16>, vector<8x128xf32> -> vector<8x128xf32>
    %123 = arith.addf %120, %122 : vector<8x128xf32>
    %124 = arith.negf %123 : vector<8x128xf32>
    %125 = math.exp %124 : vector<8x128xf32>
    %cst_30 = arith.constant 1.000000e+00 : f32
    %126 = vector.broadcast %cst_30 : f32 to vector<8x128xf32>
    %127 = arith.addf %126, %125 : vector<8x128xf32>
    %128 = arith.divf %126, %127 : vector<8x128xf32>
    %129 = vector.extract_strided_slice %128 {offsets = [0, 0], sizes = [8, 32], strides = [1, 1]} : vector<8x128xf32> to vector<8x32xf32>
    %130 = vector.extract_strided_slice %128 {offsets = [0, 32], sizes = [8, 32], strides = [1, 1]} : vector<8x128xf32> to vector<8x32xf32>
    %131 = vector.extract_strided_slice %128 {offsets = [0, 64], sizes = [8, 32], strides = [1, 1]} : vector<8x128xf32> to vector<8x32xf32>
    %cst_31 = arith.constant 2.000000e+00 : f32
    %132 = vector.broadcast %cst_31 : f32 to vector<8x32xf32>
    %133 = arith.mulf %132, %131 : vector<8x32xf32>
    %cst_32 = arith.constant 1.000000e+00 : f32
    %134 = vector.broadcast %cst_32 : f32 to vector<8x32xf32>
    %135 = arith.subf %133, %134 : vector<8x32xf32>
    %136 = vector.extract_strided_slice %128 {offsets = [0, 96], sizes = [8, 32], strides = [1, 1]} : vector<8x128xf32> to vector<8x32xf32>
    %137 = arith.mulf %130, %112 : vector<8x32xf32>
    %138 = arith.mulf %129, %135 : vector<8x32xf32>
    %139 = arith.addf %137, %138 : vector<8x32xf32>
    %140 = math.tanh %139 : vector<8x32xf32>
    %141 = arith.mulf %136, %140 : vector<8x32xf32>
    %cst_33 = arith.constant 4.000000e+00 : f32
    %142 = vector.broadcast %cst_33 : f32 to vector<8x1xf32>
    %143 = arith.cmpf oeq, %3, %142 : vector<8x1xf32>
    %144 = vector.shape_cast %143 : vector<8x1xi1> to vector<8x1xi1>
    %145 = vector.broadcast %144 : vector<8x1xi1> to vector<8x32xi1>
    %146 = arith.select %145, %141, %119 : vector<8x32xi1>, vector<8x32xf32>
    %147 = vector.extract_strided_slice %8 {offsets = [40, 0], sizes = [8, 128], strides = [1, 1]} : vector<64x128xf32> to vector<8x128xf32>
    %148 = arith.truncf %141 : vector<8x32xf32> to vector<8x32xbf16>
    %cst_34 = arith.constant dense<0.000000e+00> : vector<8x128xf32>
    %149 = tpu.matmul %148, %1, %cst_34 {dimension_numbers = #tpu.dot_dimension_numbers<[1], [0], [0], [1], [0, 0, 1, 1], [], []>} : vector<8x32xbf16>, vector<32x128xbf16>, vector<8x128xf32> -> vector<8x128xf32>
    %150 = arith.addf %147, %149 : vector<8x128xf32>
    %151 = arith.negf %150 : vector<8x128xf32>
    %152 = math.exp %151 : vector<8x128xf32>
    %cst_35 = arith.constant 1.000000e+00 : f32
    %153 = vector.broadcast %cst_35 : f32 to vector<8x128xf32>
    %154 = arith.addf %153, %152 : vector<8x128xf32>
    %155 = arith.divf %153, %154 : vector<8x128xf32>
    %156 = vector.extract_strided_slice %155 {offsets = [0, 0], sizes = [8, 32], strides = [1, 1]} : vector<8x128xf32> to vector<8x32xf32>
    %157 = vector.extract_strided_slice %155 {offsets = [0, 32], sizes = [8, 32], strides = [1, 1]} : vector<8x128xf32> to vector<8x32xf32>
    %158 = vector.extract_strided_slice %155 {offsets = [0, 64], sizes = [8, 32], strides = [1, 1]} : vector<8x128xf32> to vector<8x32xf32>
    %cst_36 = arith.constant 2.000000e+00 : f32
    %159 = vector.broadcast %cst_36 : f32 to vector<8x32xf32>
    %160 = arith.mulf %159, %158 : vector<8x32xf32>
    %cst_37 = arith.constant 1.000000e+00 : f32
    %161 = vector.broadcast %cst_37 : f32 to vector<8x32xf32>
    %162 = arith.subf %160, %161 : vector<8x32xf32>
    %163 = vector.extract_strided_slice %155 {offsets = [0, 96], sizes = [8, 32], strides = [1, 1]} : vector<8x128xf32> to vector<8x32xf32>
    %164 = arith.mulf %157, %139 : vector<8x32xf32>
    %165 = arith.mulf %156, %162 : vector<8x32xf32>
    %166 = arith.addf %164, %165 : vector<8x32xf32>
    %167 = math.tanh %166 : vector<8x32xf32>
    %168 = arith.mulf %163, %167 : vector<8x32xf32>
    %cst_38 = arith.constant 5.000000e+00 : f32
    %169 = vector.broadcast %cst_38 : f32 to vector<8x1xf32>
    %170 = arith.cmpf oeq, %3, %169 : vector<8x1xf32>
    %171 = vector.shape_cast %170 : vector<8x1xi1> to vector<8x1xi1>
    %172 = vector.broadcast %171 : vector<8x1xi1> to vector<8x32xi1>
    %173 = arith.select %172, %168, %146 : vector<8x32xi1>, vector<8x32xf32>
    %174 = vector.extract_strided_slice %8 {offsets = [48, 0], sizes = [8, 128], strides = [1, 1]} : vector<64x128xf32> to vector<8x128xf32>
    %175 = arith.truncf %168 : vector<8x32xf32> to vector<8x32xbf16>
    %cst_39 = arith.constant dense<0.000000e+00> : vector<8x128xf32>
    %176 = tpu.matmul %175, %1, %cst_39 {dimension_numbers = #tpu.dot_dimension_numbers<[1], [0], [0], [1], [0, 0, 1, 1], [], []>} : vector<8x32xbf16>, vector<32x128xbf16>, vector<8x128xf32> -> vector<8x128xf32>
    %177 = arith.addf %174, %176 : vector<8x128xf32>
    %178 = arith.negf %177 : vector<8x128xf32>
    %179 = math.exp %178 : vector<8x128xf32>
    %cst_40 = arith.constant 1.000000e+00 : f32
    %180 = vector.broadcast %cst_40 : f32 to vector<8x128xf32>
    %181 = arith.addf %180, %179 : vector<8x128xf32>
    %182 = arith.divf %180, %181 : vector<8x128xf32>
    %183 = vector.extract_strided_slice %182 {offsets = [0, 0], sizes = [8, 32], strides = [1, 1]} : vector<8x128xf32> to vector<8x32xf32>
    %184 = vector.extract_strided_slice %182 {offsets = [0, 32], sizes = [8, 32], strides = [1, 1]} : vector<8x128xf32> to vector<8x32xf32>
    %185 = vector.extract_strided_slice %182 {offsets = [0, 64], sizes = [8, 32], strides = [1, 1]} : vector<8x128xf32> to vector<8x32xf32>
    %cst_41 = arith.constant 2.000000e+00 : f32
    %186 = vector.broadcast %cst_41 : f32 to vector<8x32xf32>
    %187 = arith.mulf %186, %185 : vector<8x32xf32>
    %cst_42 = arith.constant 1.000000e+00 : f32
    %188 = vector.broadcast %cst_42 : f32 to vector<8x32xf32>
    %189 = arith.subf %187, %188 : vector<8x32xf32>
    %190 = vector.extract_strided_slice %182 {offsets = [0, 96], sizes = [8, 32], strides = [1, 1]} : vector<8x128xf32> to vector<8x32xf32>
    %191 = arith.mulf %184, %166 : vector<8x32xf32>
    %192 = arith.mulf %183, %189 : vector<8x32xf32>
    %193 = arith.addf %191, %192 : vector<8x32xf32>
    %194 = math.tanh %193 : vector<8x32xf32>
    %195 = arith.mulf %190, %194 : vector<8x32xf32>
    %cst_43 = arith.constant 6.000000e+00 : f32
    %196 = vector.broadcast %cst_43 : f32 to vector<8x1xf32>
    %197 = arith.cmpf oeq, %3, %196 : vector<8x1xf32>
    %198 = vector.shape_cast %197 : vector<8x1xi1> to vector<8x1xi1>
    %199 = vector.broadcast %198 : vector<8x1xi1> to vector<8x32xi1>
    %200 = arith.select %199, %195, %173 : vector<8x32xi1>, vector<8x32xf32>
    %201 = vector.extract_strided_slice %8 {offsets = [56, 0], sizes = [8, 128], strides = [1, 1]} : vector<64x128xf32> to vector<8x128xf32>
    %202 = arith.truncf %195 : vector<8x32xf32> to vector<8x32xbf16>
    %cst_44 = arith.constant dense<0.000000e+00> : vector<8x128xf32>
    %203 = tpu.matmul %202, %1, %cst_44 {dimension_numbers = #tpu.dot_dimension_numbers<[1], [0], [0], [1], [0, 0, 1, 1], [], []>} : vector<8x32xbf16>, vector<32x128xbf16>, vector<8x128xf32> -> vector<8x128xf32>
    %204 = arith.addf %201, %203 : vector<8x128xf32>
    %205 = arith.negf %204 : vector<8x128xf32>
    %206 = math.exp %205 : vector<8x128xf32>
    %cst_45 = arith.constant 1.000000e+00 : f32
    %207 = vector.broadcast %cst_45 : f32 to vector<8x128xf32>
    %208 = arith.addf %207, %206 : vector<8x128xf32>
    %209 = arith.divf %207, %208 : vector<8x128xf32>
    %210 = vector.extract_strided_slice %209 {offsets = [0, 0], sizes = [8, 32], strides = [1, 1]} : vector<8x128xf32> to vector<8x32xf32>
    %211 = vector.extract_strided_slice %209 {offsets = [0, 32], sizes = [8, 32], strides = [1, 1]} : vector<8x128xf32> to vector<8x32xf32>
    %212 = vector.extract_strided_slice %209 {offsets = [0, 64], sizes = [8, 32], strides = [1, 1]} : vector<8x128xf32> to vector<8x32xf32>
    %cst_46 = arith.constant 2.000000e+00 : f32
    %213 = vector.broadcast %cst_46 : f32 to vector<8x32xf32>
    %214 = arith.mulf %213, %212 : vector<8x32xf32>
    %cst_47 = arith.constant 1.000000e+00 : f32
    %215 = vector.broadcast %cst_47 : f32 to vector<8x32xf32>
    %216 = arith.subf %214, %215 : vector<8x32xf32>
    %217 = vector.extract_strided_slice %209 {offsets = [0, 96], sizes = [8, 32], strides = [1, 1]} : vector<8x128xf32> to vector<8x32xf32>
    %218 = arith.mulf %211, %193 : vector<8x32xf32>
    %219 = arith.mulf %210, %216 : vector<8x32xf32>
    %220 = arith.addf %218, %219 : vector<8x32xf32>
    %221 = math.tanh %220 : vector<8x32xf32>
    %222 = arith.mulf %217, %221 : vector<8x32xf32>
    %cst_48 = arith.constant 7.000000e+00 : f32
    %223 = vector.broadcast %cst_48 : f32 to vector<8x1xf32>
    %224 = arith.cmpf oeq, %3, %223 : vector<8x1xf32>
    %225 = vector.shape_cast %224 : vector<8x1xi1> to vector<8x1xi1>
    %226 = vector.broadcast %225 : vector<8x1xi1> to vector<8x32xi1>
    %227 = arith.select %226, %222, %200 : vector<8x32xi1>, vector<8x32xf32>
    %228 = vector.extract_strided_slice %2 {offsets = [9, 0], sizes = [1, 32], strides = [1, 1]} : vector<11x128xf32> to vector<1x32xf32>
    %229 = vector.extract_strided_slice %2 {offsets = [10, 0], sizes = [1, 1], strides = [1, 1]} : vector<11x128xf32> to vector<1x1xf32>
    %230 = vector.broadcast %228 : vector<1x32xf32> to vector<8x32xf32>
    %231 = arith.mulf %227, %230 : vector<8x32xf32>
    %cst_49 = arith.constant dense<0.000000e+00> : vector<8xf32>
    %232 = vector.multi_reduction <add>, %231, %cst_49 [1] : vector<8x32xf32> to vector<8xf32>
    %233 = vector.shape_cast %232 : vector<8xf32> to vector<8x1xf32>
    %234 = vector.broadcast %229 : vector<1x1xf32> to vector<8x1xf32>
    %235 = arith.addf %233, %234 : vector<8x1xf32>
    %236 = arith.negf %235 : vector<8x1xf32>
    %237 = math.exp %236 : vector<8x1xf32>
    %cst_50 = arith.constant 1.000000e+00 : f32
    %238 = vector.broadcast %cst_50 : f32 to vector<8x1xf32>
    %239 = arith.addf %238, %237 : vector<8x1xf32>
    %240 = arith.divf %238, %239 : vector<8x1xf32>
    %c0_51 = arith.constant 0 : index
    %c0_52 = arith.constant 0 : index
    %241 = vector.load %arg3[%c0_51, %c0_52] : memref<8x1xf32, #tpu.memory_space<vmem>>, vector<8x1xf32>
    tpu.vector_store %arg3[%c0_51, %c0_52], %240 {strides = array<i32>} : memref<8x1xf32, #tpu.memory_space<vmem>>, vector<8x1xf32>,
    return
  }
}

</mosaic_0001>

<bundles_post_ra>
// kernel: _lstm_forward_impl.1
= control target key start
LH: loop header
LB: loop body
LE: loop exit
PB: predicated region body
PF: predicated region fallthrough
CT: control target
= control target key end

     0   :  { %v1026_v0 = vmov 0.0   ;;  %vm1027_vm0 = vmmov 0   ;;  %v1028_v1 = vmov 0   ;;  %vm61_vm1 = vcmask 130048   ;;  %s1029_s23 = smov 64   ;;  %s1030_s24 = smov 32   ;;  %s1268_s1 = inlined_call_operand.vmem [shape: bf16[48,128], index: 1, kind: input, shape index: {}]   ;;  %s1269_s0 = inlined_call_operand.vmem [shape: bf16[64,16], index: 0, kind: input, shape index: {}]   ;;  %s1270_s2 = inlined_call_operand.vmem [shape: f32[11,128], index: 2, kind: input, shape index: {}]   ;;  %s1271_s3 = inlined_call_operand.vmem [shape: f32[8,1], index: 3, kind: output, shape index: {}]  }
   0x1   :  { %895 = vmatprep.subr.bf16.mxu1 %v1026_v0  ;;  %899 = vmatprep.mubr.msk.bf16.mxu1 %vm1027_vm0, %v1026_v0  ;;  %v967_v2 = vld [vmem:[%s1268_s1] sm:$0xff]   ;;  %v1063_v3 = vld [vmem:[%s1268_s1 + $0x8] sm:$0xff]   ;;  %v1068_v4 = vld [vmem:[%s1268_s1 + $0x10] sm:$0xff]   ;;  %v31_v7 = vlaneseq  ;;  %vm151_vm2 = vcmask 261120  }
   0x2   :  { %965 = vset.pattern.permute.xlu0 %v1028_v1  ;;  %966 = vset.pattern.permute.xlu1 %v1028_v1  ;;  %v970_v5 = vld [vmem:[%s1269_s0] sm:$0xff]   ;;  %v971_v6 = vld [vmem:[%s1269_s0 + $0x8] sm:$0xff]   ;;  %v972_v55 = vld [vmem:[%s1269_s0 + $0x10] sm:$0xff]  }
   0x3   :  { %885 = vmatprep.subr.bf16.mxu0 %v967_v2  ;;  %896 = vmatpush3.bf16.msra.mxu1 %v1063_v3  ;;  %v1094_v8 = vshrl.u32 %v31_v7, 7  ;;  %v1100_v10 = vld [vmem:[%s1270_s2 + $0x8] sm:$0x7]  ;;  %v973_v56 = vld [vmem:[%s1269_s0 + $0x18] sm:$0xff]  }
   0x4   :  { %886 = vmatpush3.bf16.msra.mxu0 %v967_v2  ;;  %887 = vmatprep.mubr.msk.bf16.mxu0 %vm61_vm1, %v970_v5 }
   0x5   :  { %897 = vmatprep.subr.bf16.mxu1 %v1026_v0  ;;  %911 = vmatprep.subr.bf16.mxu0 %v1026_v0  ;;  %v33_v9 = vsub.s32 0, %v1094_v8 }
   0x7   :  { %888 = vmatmul.mubr.msk.bf16.vlgmr.msra.gmra.mrb[0].mxu0 %vm61_vm1, %v971_v6  ;;  %898 = vmatpush3.bf16.msra.mxu1 %v1068_v4  ;;  %v1103_v11 = vrot.slane %v1100_v10, %v33_v9 }
   0x8   :  { %903 = vmatprep.subr.bf16.mxu1 %v1026_v0  ;;  %912 = vmatpush3.bf16.msra.mxu0 %v1063_v3 }
   0x9   :  { %913 = vmatprep.subr.bf16.mxu0 %v1026_v0  ;;  %891 = vmatprep.mubr.msk.bf16.mxu0 %vm61_vm1, %v972_v55 }
   0xa   :  { %900 = vmatmul.mubr.bf16.vlgmr.msra.gmra.mrb[0].mxu1 %v1028_v1 }
   0xb   :  { %904 = vmatpush3.bf16.msra.mxu1 %v1063_v3  ;;  %907 = vmatprep.mubr.msk.bf16.mxu1 %vm1027_vm0, %v1026_v0 }
   0xc   :  { %905 = vmatprep.subr.bf16.mxu1 %v1026_v0  ;;  %914 = vmatpush3.bf16.msra.mxu0 %v1068_v4 }
   0xd   :  { %927 = vmatprep.subr.bf16.mxu0 %v1026_v0 }
   0xf   :  { %906 = vmatpush3.bf16.msra.mxu1 %v1068_v4  ;;  %892 = vmatmul.mubr.msk.bf16.gmra.mrb[4].mxu0 %vm61_vm1, %v973_v56 }
  0x10   :  { %919 = vmatprep.subr.bf16.mxu1 %v1026_v0  ;;  %915 = vmatprep.mubr.msk.bf16.mxu0 %vm1027_vm0, %v1026_v0 }
  0xda   :  { %v1105_v12 = vpop.f32.mrb[0].mxu0 }
  0xdb   :  { %v108_v13 = vpop.f32.mrb[1].mxu0  ;;  %v117_v6 = vadd.f32 %v1105_v12, %v1103_v11 }
  0xdc   :  { %v109_v14 = vadd.f32 %v108_v13, %v1103_v11  ;;  %v1108_v15 = vpop.f32.mrb[2].mxu0 }
  0xdd   :  { %v111_v16 = vpop.f32.mrb[3].mxu0  ;;  %v189_v17 = vpop.f32.mrb[0].mxu1 }
  0xde   :  { %v195_v18 = vadd.f32 %v189_v17, %v109_v14  ;;  %v901_v19 = vpop.f32.mrb[1].mxu1  ;;  %v112_v38 = vadd.f32 %v111_v16, %v1103_v11 }
  0xdf   :  { %v192_v20 = vpop.f32.mrb[2].mxu1 }
  0xe0   :  { %v832_v21 = vmul.f32 -1.442695, %v195_v18  ;;  %v902_v22 = vpop.f32.mrb[3].mxu1 }
  0xe2   :  { %974 = vpow2.f32 %v832_v21  ;;  %v1144_v61 = vpop.f32.mrb[4].mxu0 }
  0xe3   :  { %v1146_v62 = vpop.f32.mrb[5].mxu0 }
  0xe4   :  { %v1148_v63 = vpop.f32.mrb[6].mxu0 }
  0xe5   :  { %v1150_v2 = vpop.f32.mrb[7].mxu0 }
  0xec   :  { %v975_v23 = vpop.eup %974 }
  0xed   :  { %v199_v24 = vadd.f32 1.0, %v975_v23 }
  0xef   :  { %976 = vrcp.f32 %v199_v24 }
  0xf9   :  { %v977_v25 = vpop.eup %976 }
  0xfa   :  { %v202_v26 = vmul.f32 2.0, %v977_v25  ;;  %v204_v30 = vmul.f32 0.0, %v977_v25 }
  0xfc   :  { %v833_v27 = vadd.f32 -1.0, %v202_v26 }
  0xfe   :  { %206 = vrot.lane.b32.xlu0 %v833_v27, %s1029_s23 }
 0x170   :  { %v207_v28 = vpop.permute.xlu0 %206 }
 0x171   :  { %v209_v29 = vmul.f32 %v977_v25, %v207_v28 }
 0x173   :  { %211 = vrot.lane.b32.xlu0 %v209_v29, %s1030_s24 }
 0x1e5   :  { %v212_v31 = vpop.permute.xlu0 %211 }
 0x1e6   :  { %v214_v32 = vadd.f32 %v212_v31, %v204_v30 }
 0x1e8   :  { %978 = vtanh.f32 %v214_v32 }
 0x1f2   :  { %v979_v33 = vpop.eup %978 }
 0x1f3   :  { %217 = vrot.lane.b32.xlu1 %v979_v33, %s1029_s23 }
 0x265   :  { %v218_v34 = vpop.permute.xlu1 %217 }
 0x266   :  { %v1113_v35 = vmul.f32 %v977_v25, %v218_v34 }
 0x268   :  { %v228_v36 = vpack.c.bf16 %v1113_v35, %v1113_v35 }
 0x26a   :  { %230 = vrot.lane.b32.xlu1 %v228_v36, %s1030_s24 }
 0x2dc   :  { %v231_v37 = vpop.permute.xlu1 %230 }
 0x2dd   :  { %908 = vmatmul.mubr.msk.bf16.vlgmr.msra.gmra.mrb[4].mxu1 %vm151_vm2, %v231_v37 }
 0x2de   :  { %920 = vmatpush3.bf16.msra.mxu1 %v1063_v3  ;;  %923 = vmatprep.mubr.msk.bf16.mxu1 %vm1027_vm0, %v1026_v0 }
 0x2df   :  { %921 = vmatprep.subr.bf16.mxu1 %v1026_v0 }
 0x2e2   :  { %922 = vmatpush3.bf16.msra.mxu1 %v1068_v4 }
 0x2e3   :  { %935 = vmatprep.subr.bf16.mxu1 %v1026_v0 }
 0x3b0   :  { %v269_v39 = vpop.f32.mrb[4].mxu1 }
 0x3b1   :  { %v275_v40 = vadd.f32 %v269_v39, %v112_v38  ;;  %v909_v41 = vpop.f32.mrb[5].mxu1 }
 0x3b2   :  { %v272_v42 = vpop.f32.mrb[6].mxu1 }
 0x3b3   :  { %v835_v43 = vmul.f32 -1.442695, %v275_v40  ;;  %v910_v44 = vpop.f32.mrb[7].mxu1 }
 0x3b5   :  { %980 = vpow2.f32 %v835_v43 }
 0x3bf   :  { %v981_v45 = vpop.eup %980 }
 0x3c0   :  { %v279_v46 = vadd.f32 1.0, %v981_v45 }
 0x3c2   :  { %982 = vrcp.f32 %v279_v46 }
 0x3cc   :  { %v983_v47 = vpop.eup %982 }
 0x3cd   :  { %v282_v48 = vmul.f32 2.0, %v983_v47  ;;  %v284_v52 = vmul.f32 %v983_v47, %v214_v32  ;;  %v120_v32 = vadd.f32 %v1108_v15, %v1103_v11 }
 0x3cf   :  { %v836_v49 = vadd.f32 -1.0, %v282_v48 }
 0x3d1   :  { %286 = vrot.lane.b32.xlu0 %v836_v49, %s1029_s23 }
 0x443   :  { %v287_v50 = vpop.permute.xlu0 %286 }
 0x444   :  { %v289_v51 = vmul.f32 %v983_v47, %v287_v50 }
 0x446   :  { %291 = vrot.lane.b32.xlu1 %v289_v51, %s1030_s24 }
 0x4b8   :  { %v292_v53 = vpop.permute.xlu1 %291 }
 0x4b9   :  { %v294_v54 = vadd.f32 %v292_v53, %v284_v52 }
 0x4bb   :  { %984 = vtanh.f32 %v294_v54 }
 0x4c5   :  { %v985_v57 = vpop.eup %984 }
 0x4c6   :  { %297 = vrot.lane.b32.xlu0 %v985_v57, %s1029_s23 }
 0x538   :  { %v298_v58 = vpop.permute.xlu0 %297 }
 0x539   :  { %v1139_v59 = vmul.f32 %v983_v47, %v298_v58 }
 0x53b   :  { %v308_v60 = vpack.c.bf16 %v1139_v59, %v1139_v59 }
 0x53d   :  { %310 = vrot.lane.b32.xlu1 %v308_v60, %s1030_s24 }
 0x5af   :  { %v311_v5 = vpop.permute.xlu1 %310 }
 0x5b0   :  { %916 = vmatmul.mubr.msk.bf16.vlgmr.msra.gmra.mrb[8].mxu0 %vm151_vm2, %v311_v5 }
 0x5b1   :  { %928 = vmatpush3.bf16.msra.mxu0 %v1063_v3  ;;  %931 = vmatprep.mubr.msk.bf16.mxu0 %vm1027_vm0, %v1026_v0 }
 0x5b2   :  { %929 = vmatprep.subr.bf16.mxu0 %v1026_v0 }
 0x5b5   :  { %930 = vmatpush3.bf16.msra.mxu0 %v1068_v4 }
 0x5b6   :  { %943 = vmatprep.subr.bf16.mxu0 %v1026_v0 }
 0x683   :  { %v349_v7 = vpop.f32.mrb[8].mxu0 }
 0x684   :  { %v355_v9 = vadd.f32 %v349_v7, %v117_v6  ;;  %v917_v13 = vpop.f32.mrb[9].mxu0 }
 0x685   :  { %v352_v14 = vpop.f32.mrb[10].mxu0 }
 0x686   :  { %v838_v16 = vmul.f32 -1.442695, %v355_v9  ;;  %v918_v17 = vpop.f32.mrb[11].mxu0 }
 0x688   :  { %986 = vpow2.f32 %v838_v16 }
 0x692   :  { %v987_v18 = vpop.eup %986 }
 0x693   :  { %v359_v19 = vadd.f32 1.0, %v987_v18 }
 0x695   :  { %988 = vrcp.f32 %v359_v19 }
 0x69f   :  { %v989_v20 = vpop.eup %988 }
 0x6a0   :  { %v362_v21 = vmul.f32 2.0, %v989_v20  ;;  %v364_v12 = vmul.f32 %v989_v20, %v294_v54  ;;  %v125_v54 = vadd.f32 %v1146_v62, %v1103_v11 }
 0x6a2   :  { %v839_v22 = vadd.f32 -1.0, %v362_v21 }
 0x6a4   :  { %366 = vrot.lane.b32.xlu0 %v839_v22, %s1029_s23 }
 0x716   :  { %v367_v23 = vpop.permute.xlu0 %366 }
 0x717   :  { %v369_v24 = vmul.f32 %v989_v20, %v367_v23 }
 0x719   :  { %371 = vrot.lane.b32.xlu1 %v369_v24, %s1030_s24 }
 0x78b   :  { %v372_v25 = vpop.permute.xlu1 %371 }
 0x78c   :  { %v374_v26 = vadd.f32 %v372_v25, %v364_v12  ;;  %v128_v12 = vadd.f32 %v1150_v2, %v1103_v11 }
 0x78e   :  { %990 = vtanh.f32 %v374_v26 }
 0x798   :  { %v991_v27 = vpop.eup %990 }
 0x799   :  { %377 = vrot.lane.b32.xlu0 %v991_v27, %s1029_s23 }
 0x80b   :  { %v378_v28 = vpop.permute.xlu0 %377 }
 0x80c   :  { %v1164_v29 = vmul.f32 %v989_v20, %v378_v28 }
 0x80e   :  { %v388_v30 = vpack.c.bf16 %v1164_v29, %v1164_v29 }
 0x810   :  { %390 = vrot.lane.b32.xlu1 %v388_v30, %s1030_s24 }
 0x882   :  { %v391_v31 = vpop.permute.xlu1 %390 }
 0x883   :  { %924 = vmatmul.mubr.msk.bf16.vlgmr.msra.gmra.mrb[8].mxu1 %vm151_vm2, %v391_v31 }
 0x884   :  { %936 = vmatpush3.bf16.msra.mxu1 %v1063_v3  ;;  %939 = vmatprep.mubr.msk.bf16.mxu1 %vm1027_vm0, %v1026_v0 }
 0x885   :  { %937 = vmatprep.subr.bf16.mxu1 %v1026_v0 }
 0x888   :  { %938 = vmatpush3.bf16.msra.mxu1 %v1068_v4 }
 0x889   :  { %951 = vmatprep.subr.bf16.mxu1 %v1026_v0 }
 0x956   :  { %v429_v33 = vpop.f32.mrb[8].mxu1 }
 0x957   :  { %v435_v34 = vadd.f32 %v429_v33, %v120_v32  ;;  %v925_v36 = vpop.f32.mrb[9].mxu1 }
 0x958   :  { %v432_v37 = vpop.f32.mrb[10].mxu1 }
 0x959   :  { %v841_v38 = vmul.f32 -1.442695, %v435_v34  ;;  %v926_v39 = vpop.f32.mrb[11].mxu1 }
 0x95b   :  { %992 = vpow2.f32 %v841_v38 }
 0x965   :  { %v993_v40 = vpop.eup %992 }
 0x966   :  { %v439_v41 = vadd.f32 1.0, %v993_v40 }
 0x968   :  { %994 = vrcp.f32 %v439_v41 }
 0x972   :  { %v995_v42 = vpop.eup %994 }
 0x973   :  { %v442_v43 = vmul.f32 2.0, %v995_v42  ;;  %v444_v15 = vmul.f32 %v995_v42, %v374_v26 }
 0x975   :  { %v842_v44 = vadd.f32 -1.0, %v442_v43 }
 0x977   :  { %446 = vrot.lane.b32.xlu0 %v842_v44, %s1029_s23  ;;  %v133_v44 = vadd.f32 %v1144_v61, %v1103_v11 }
 0x9e9   :  { %v447_v45 = vpop.permute.xlu0 %446 }
 0x9ea   :  { %v449_v46 = vmul.f32 %v995_v42, %v447_v45 }
 0x9ec   :  { %451 = vrot.lane.b32.xlu1 %v449_v46, %s1030_s24 }
 0xa5e   :  { %v452_v47 = vpop.permute.xlu1 %451 }
 0xa5f   :  { %v454_v48 = vadd.f32 %v452_v47, %v444_v15 }
 0xa61   :  { %996 = vtanh.f32 %v454_v48 }
 0xa6b   :  { %v997_v49 = vpop.eup %996 }
 0xa6c   :  { %457 = vrot.lane.b32.xlu0 %v997_v49, %s1029_s23 }
 0xade   :  { %v458_v50 = vpop.permute.xlu0 %457 }
 0xadf   :  { %v1181_v51 = vmul.f32 %v995_v42, %v458_v50 }
 0xae1   :  { %v468_v52 = vpack.c.bf16 %v1181_v51, %v1181_v51 }
 0xae3   :  { %470 = vrot.lane.b32.xlu1 %v468_v52, %s1030_s24 }
 0xb55   :  { %v471_v53 = vpop.permute.xlu1 %470 }
 0xb56   :  { %932 = vmatmul.mubr.msk.bf16.vlgmr.msra.gmra.mrb[12].mxu0 %vm151_vm2, %v471_v53 }
 0xb57   :  { %944 = vmatpush3.bf16.msra.mxu0 %v1063_v3  ;;  %947 = vmatprep.mubr.msk.bf16.mxu0 %vm1027_vm0, %v1026_v0 }
 0xb58   :  { %945 = vmatprep.subr.bf16.mxu0 %v1026_v0 }
 0xb5b   :  { %946 = vmatpush3.bf16.msra.mxu0 %v1068_v4 }
 0xc29   :  { %v509_v55 = vpop.f32.mrb[12].mxu0 }
 0xc2a   :  { %v515_v56 = vadd.f32 %v509_v55, %v125_v54  ;;  %v933_v57 = vpop.f32.mrb[13].mxu0 }
 0xc2b   :  { %v512_v58 = vpop.f32.mrb[14].mxu0 }
 0xc2c   :  { %v844_v60 = vmul.f32 -1.442695, %v515_v56  ;;  %v934_v5 = vpop.f32.mrb[15].mxu0 }
 0xc2e   :  { %998 = vpow2.f32 %v844_v60 }
 0xc38   :  { %v999_v6 = vpop.eup %998 }
 0xc39   :  { %v519_v7 = vadd.f32 1.0, %v999_v6 }
 0xc3b   :  { %1000 = vrcp.f32 %v519_v7 }
 0xc45   :  { %v1001_v9 = vpop.eup %1000 }
 0xc46   :  { %v522_v13 = vmul.f32 2.0, %v1001_v9  ;;  %v524_v62 = vmul.f32 %v1001_v9, %v454_v48 }
 0xc48   :  { %v845_v14 = vadd.f32 -1.0, %v522_v13 }
 0xc4a   :  { %526 = vrot.lane.b32.xlu0 %v845_v14, %s1029_s23  ;;  %v136_v14 = vadd.f32 %v1148_v63, %v1103_v11 }
 0xcbc   :  { %v527_v16 = vpop.permute.xlu0 %526 }
 0xcbd   :  { %v529_v17 = vmul.f32 %v1001_v9, %v527_v16 }
 0xcbf   :  { %531 = vrot.lane.b32.xlu1 %v529_v17, %s1030_s24 }
 0xd31   :  { %v532_v18 = vpop.permute.xlu1 %531 }
 0xd32   :  { %v534_v19 = vadd.f32 %v532_v18, %v524_v62 }
 0xd34   :  { %1002 = vtanh.f32 %v534_v19 }
 0xd3e   :  { %v1003_v20 = vpop.eup %1002 }
 0xd3f   :  { %537 = vrot.lane.b32.xlu0 %v1003_v20, %s1029_s23 }
 0xdb1   :  { %v538_v21 = vpop.permute.xlu0 %537 }
 0xdb2   :  { %v1197_v22 = vmul.f32 %v1001_v9, %v538_v21 }
 0xdb4   :  { %v548_v23 = vpack.c.bf16 %v1197_v22, %v1197_v22 }
 0xdb6   :  { %550 = vrot.lane.b32.xlu1 %v548_v23, %s1030_s24 }
 0xe28   :  { %v551_v24 = vpop.permute.xlu1 %550 }
 0xe29   :  { %940 = vmatmul.mubr.msk.bf16.vlgmr.msra.gmra.mrb[12].mxu1 %vm151_vm2, %v551_v24 }
 0xe2a   :  { %952 = vmatpush3.bf16.msra.mxu1 %v1063_v3  ;;  %955 = vmatprep.mubr.msk.bf16.mxu1 %vm1027_vm0, %v1026_v0 }
 0xe2b   :  { %953 = vmatprep.subr.bf16.mxu1 %v1026_v0 }
 0xe2e   :  { %954 = vmatpush3.bf16.msra.mxu1 %v1068_v4 }
 0xefc   :  { %v589_v25 = vpop.f32.mrb[12].mxu1 }
 0xefd   :  { %v595_v26 = vadd.f32 %v589_v25, %v128_v12  ;;  %v941_v27 = vpop.f32.mrb[13].mxu1  ;;  %v21_v12 = vld [vmem:[%s1270_s2] sm:$0xff]  ;;  %s1031_s2 = smov 96  }
 0xefe   :  { %v592_v28 = vpop.f32.mrb[14].mxu1  ;;  %vm221_vm3 = vcmp.eq.f32.partialorder %v21_v12, 0.0  ;;  %vm461_vm4 = vcmp.eq.f32.partialorder %v21_v12, 3.0  ;;  %vm621_vm5 = vcmp.eq.f32.partialorder %v21_v12, 5.0  ;;  %vm781_vm6 = vcmp.eq.f32.partialorder %v21_v12, 7.0 }
 0xeff   :  { %v847_v30 = vmul.f32 -1.442695, %v595_v26  ;;  %v942_v31 = vpop.f32.mrb[15].mxu1  ;;  %v222_v11 = vsel %vm221_vm3, 1, %v1028_v1  ;;  %v462_v63 = vsel %vm461_vm4, 1, %v1028_v1  ;;  %v622_v27 = vsel %vm621_vm5, 1, %v1028_v1 }
 0xf00   :  { %v782_v28 = vsel %vm781_vm6, 1, %v1028_v1  ;;  %vm301_vm7 = vcmp.eq.f32.partialorder %v21_v12, 1.0  ;;  %vm381_vm8 = vcmp.eq.f32.partialorder %v21_v12, 2.0  ;;  %vm541_vm9 = vcmp.eq.f32.partialorder %v21_v12, 4.0 }
 0xf01   :  { %1004 = vpow2.f32 %v847_v30  ;;  %vm701_vm10 = vcmp.eq.f32.partialorder %v21_v12, 6.0  ;;  %vm815_vm4 = vcmask 7168  }
 0xf0b   :  { %v1005_v32 = vpop.eup %1004 }
 0xf0c   :  { %v599_v33 = vadd.f32 1.0, %v1005_v32  ;;  %v790_v32 = vsub.s32 1, %v1094_v8 }
 0xf0e   :  { %1006 = vrcp.f32 %v599_v33  ;;  %v302_v33 = vsel %vm301_vm7, 1, %v1028_v1 }
 0xf18   :  { %v1007_v3 = vpop.eup %1006 }
 0xf19   :  { %v602_v34 = vmul.f32 2.0, %v1007_v3  ;;  %v604_v2 = vmul.f32 %v1007_v3, %v534_v19 }
 0xf1b   :  { %v848_v36 = vadd.f32 -1.0, %v602_v34  ;;  %v382_v34 = vsel %vm381_vm8, 1, %v1028_v1 }
 0xf1d   :  { %606 = vrot.lane.b32.xlu0 %v848_v36, %s1029_s23  ;;  %v542_v36 = vsel %vm541_vm9, 1, %v1028_v1 }
 0xf8f   :  { %v607_v0 = vpop.permute.xlu0 %606 }
 0xf90   :  { %v609_v4 = vmul.f32 %v1007_v3, %v607_v0  ;;  %v702_v0 = vsel %vm701_vm10, 1, %v1028_v1 }
 0xf92   :  { %611 = vrot.lane.b32.xlu1 %v609_v4, %s1030_s24 }
0x1004   :  { %v612_v37 = vpop.permute.xlu1 %611 }
0x1005   :  { %v614_v38 = vadd.f32 %v612_v37, %v604_v2 }
0x1007   :  { %1008 = vtanh.f32 %v614_v38 }
0x1011   :  { %v1009_v39 = vpop.eup %1008 }
0x1012   :  { %617 = vrot.lane.b32.xlu0 %v1009_v39, %s1029_s23 }
0x1084   :  { %v618_v40 = vpop.permute.xlu0 %617 }
0x1085   :  { %v1213_v41 = vmul.f32 %v1007_v3, %v618_v40  ;;  %v791_v3 = vrot.slane %v1100_v10, %v790_v32 }
0x1087   :  { %v628_v42 = vpack.c.bf16 %v1213_v41, %v1213_v41 }
0x1089   :  { %630 = vrot.lane.b32.xlu1 %v628_v42, %s1030_s24 }
0x10fb   :  { %v631_v43 = vpop.permute.xlu1 %630 }
0x10fc   :  { %948 = vmatmul.mubr.msk.bf16.vlgmr.msra.gmra.mrb[16].mxu0 %vm151_vm2, %v631_v43 }
0x11cf   :  { %v669_v45 = vpop.f32.mrb[16].mxu0 }
0x11d0   :  { %v675_v46 = vadd.f32 %v669_v45, %v133_v44  ;;  %v949_v15 = vpop.f32.mrb[17].mxu0 }
0x11d1   :  { %v672_v47 = vpop.f32.mrb[18].mxu0 }
0x11d2   :  { %v850_v48 = vmul.f32 -1.442695, %v675_v46  ;;  %v950_v49 = vpop.f32.mrb[19].mxu0 }
0x11d4   :  { %1010 = vpow2.f32 %v850_v48 }
0x11de   :  { %v1011_v50 = vpop.eup %1010 }
0x11df   :  { %v679_v52 = vadd.f32 1.0, %v1011_v50 }
0x11e1   :  { %1012 = vrcp.f32 %v679_v52 }
0x11eb   :  { %v1013_v53 = vpop.eup %1012 }
0x11ec   :  { %v682_v54 = vmul.f32 2.0, %v1013_v53  ;;  %v684_v61 = vmul.f32 %v1013_v53, %v614_v38 }
0x11ee   :  { %v851_v55 = vadd.f32 -1.0, %v682_v54 }
0x11f0   :  { %686 = vrot.lane.b32.xlu0 %v851_v55, %s1029_s23 }
0x1262   :  { %v687_v56 = vpop.permute.xlu0 %686 }
0x1263   :  { %v689_v57 = vmul.f32 %v1013_v53, %v687_v56 }
0x1265   :  { %691 = vrot.lane.b32.xlu1 %v689_v57, %s1030_s24 }
0x12d7   :  { %v692_v58 = vpop.permute.xlu1 %691 }
0x12d8   :  { %v694_v60 = vadd.f32 %v692_v58, %v684_v61 }
0x12da   :  { %1014 = vtanh.f32 %v694_v60 }
0x12e4   :  { %v1015_v5 = vpop.eup %1014 }
0x12e5   :  { %697 = vrot.lane.b32.xlu0 %v1015_v5, %s1029_s23 }
0x1357   :  { %v698_v6 = vpop.permute.xlu0 %697 }
0x1358   :  { %v1224_v7 = vmul.f32 %v1013_v53, %v698_v6 }
0x135a   :  { %v708_v9 = vpack.c.bf16 %v1224_v7, %v1224_v7 }
0x135c   :  { %710 = vrot.lane.b32.xlu1 %v708_v9, %s1030_s24 }
0x13ce   :  { %v711_v13 = vpop.permute.xlu1 %710 }
0x13cf   :  { %956 = vmatmul.mubr.msk.bf16.vlgmr.msra.gmra.mrb[16].mxu1 %vm151_vm2, %v711_v13 }
0x14a2   :  { %v749_v16 = vpop.f32.mrb[16].mxu1 }
0x14a3   :  { %v755_v17 = vadd.f32 %v749_v16, %v136_v14  ;;  %v957_v62 = vpop.f32.mrb[17].mxu1 }
0x14a4   :  { %v752_v18 = vpop.f32.mrb[18].mxu1 }
0x14a5   :  { %v853_v19 = vmul.f32 -1.442695, %v755_v17  ;;  %v958_v20 = vpop.f32.mrb[19].mxu1 }
0x14a7   :  { %1016 = vpow2.f32 %v853_v19 }
0x14b1   :  { %v1017_v21 = vpop.eup %1016 }
0x14b2   :  { %v759_v23 = vadd.f32 1.0, %v1017_v21 }
0x14b4   :  { %1018 = vrcp.f32 %v759_v23 }
0x14be   :  { %v1232_v24 = vpop.eup %1018 }
0x14bf   :  { %v762_v25 = vmul.f32 2.0, %v1232_v24  ;;  %v764_v4 = vmul.f32 %v1232_v24, %v694_v60 }
0x14c1   :  { %v854_v26 = vadd.f32 -1.0, %v762_v25 }
0x14c3   :  { %766 = vrot.lane.b32.xlu0 %v854_v26, %s1029_s23 }
0x14c7   :  { %224 = vperm.xlu0 %965, %v222_v11  }
0x14cb   :  { %464 = vperm.xlu0 %965, %v462_v63  }
0x14cf   :  { %624 = vperm.xlu0 %965, %v622_v27  }
0x14d3   :  { %784 = vperm.xlu0 %965, %v782_v28  }
0x14d7   :  { %793 = vrot.lane.b32.xlu0 %v791_v3, %s1031_s2 }
0x1535   :  { %v767_v30 = vpop.permute.xlu0 %766 }
0x1536   :  { %v769_v31 = vmul.f32 %v1232_v24, %v767_v30 }
0x1538   :  { %771 = vrot.lane.b32.xlu1 %v769_v31, %s1030_s24 }
0x153c   :  { %304 = vperm.xlu1 %966, %v302_v33  }
0x1540   :  { %384 = vperm.xlu1 %966, %v382_v34  }
0x1544   :  { %544 = vperm.xlu1 %966, %v542_v36  }
0x1546   :  { %v225_v40 = vpop.permute.xlu0 %224 }
0x1547   :  { %vm226_vm11 = vcmp.eq.s32.totalorder %v225_v40, 1 }
0x1548   :  { %704 = vperm.xlu1 %966, %v702_v0   ;;  %v227_v45 = vsel %vm226_vm11, %v1113_v35, 0.0 }
0x154a   :  { %v465_v43 = vpop.permute.xlu0 %464 }
0x154b   :  { %vm466_vm14 = vcmp.eq.s32.totalorder %v465_v43, 1 }
0x154e   :  { %v625_v46 = vpop.permute.xlu0 %624 }
0x154f   :  { %vm626_vm0 = vcmp.eq.s32.totalorder %v625_v46, 1 }
0x1552   :  { %v785_v49 = vpop.permute.xlu0 %784 }
0x1553   :  { %vm786_vm3 = vcmp.eq.s32.totalorder %v785_v49, 1 }
0x1556   :  { %v794_v54 = vpop.permute.xlu0 %793 }
0x15aa   :  { %v772_v2 = vpop.permute.xlu1 %771 }
0x15ab   :  { %v774_v37 = vadd.f32 %v772_v2, %v764_v4 }
0x15ad   :  { %1020 = vtanh.f32 %v774_v37 }
0x15b7   :  { %v1021_v38 = vpop.eup %1020 }
0x15b8   :  { %777 = vrot.lane.b32.xlu1 %v1021_v38, %s1029_s23 }
0x15bb   :  { %v305_v39 = vpop.permute.xlu1 %304 }
0x15bc   :  { %vm306_vm12 = vcmp.eq.s32.totalorder %v305_v39, 1 }
0x15bd   :  { %v307_v1 = vsel %vm306_vm12, %v1139_v59, %v227_v45 }
0x15bf   :  { %v385_v42 = vpop.permute.xlu1 %384 }
0x15c0   :  { %vm386_vm13 = vcmp.eq.s32.totalorder %v385_v42, 1 }
0x15c1   :  { %v387_v15 = vsel %vm386_vm13, %v1164_v29, %v307_v1 }
0x15c2   :  { %v467_v48 = vsel %vm466_vm14, %v1181_v51, %v387_v15 }
0x15c3   :  { %v545_v44 = vpop.permute.xlu1 %544 }
0x15c4   :  { %vm546_vm15 = vcmp.eq.s32.totalorder %v545_v44, 1 }
0x15c5   :  { %v547_v50 = vsel %vm546_vm15, %v1197_v22, %v467_v48  ;;  %v806_v22 = vsub.s32 2, %v1094_v8 }
0x15c6   :  { %v627_v53 = vsel %vm626_vm0, %v1213_v41, %v547_v50 }
0x15c7   :  { %v705_v47 = vpop.permute.xlu1 %704  ;;  %v807_v57 = vrot.slane %v1100_v10, %v806_v22 }
0x15c8   :  { %vm706_vm1 = vcmp.eq.s32.totalorder %v705_v47, 1 }
0x15c9   :  { %v707_v59 = vsel %vm706_vm1, %v1224_v7, %v627_v53 }
0x162a   :  { %v778_v52 = vpop.permute.xlu1 %777 }
0x162b   :  { %v780_v35 = vmul.f32 %v1232_v24, %v778_v52 }
0x162d   :  { %v787_v29 = vsel %vm786_vm3, %v780_v35, %v707_v59 }
0x162e   :  { %v796_v55 = vmul.f32 %v794_v54, %v787_v29 }
0x1630   :  { %798 = vrot.lane.b32.xlu1 %v796_v55, %s1030_s24 }
0x16a2   :  { %v799_v56 = vpop.permute.xlu1 %798 }
0x16a3   :  { %v801_v51 = vsel %vm151_vm2, %v799_v56, 0.0 }
0x16a4   :  { %802 = vadd.xlane.f32.xlu0 %v801_v51 }
0x1731   :  { %v803_v61 = vpop.xlane.xlu0 %802 }
0x1732   :  { %v808_v41 = vadd.f32 %v807_v57, %v803_v61 }
0x1734   :  { %v855_v58 = vmul.f32 -1.442695, %v808_v41 }
0x1736   :  { %1022 = vpow2.f32 %v855_v58 }
0x1740   :  { %v1023_v60 = vpop.eup %1022 }
0x1741   :  { %v812_v5 = vadd.f32 1.0, %v1023_v60 }
0x1743   :  { %1024 = vrcp.f32 %v812_v5 }
0x174d   :  { %v1025_v6 = vpop.eup %1024 }
0x174e   :  { %816 = vst.msk [vmem:[%s1271_s3] sm:$0xff] %vm815_vm4, %v1025_v6 }

</bundles_post_ra>
